<compile_context>
chip_gen: v6e
topology: v6e:2x2x1
jax: 0.10.0
libtpu: 0.0.40
codegen_flags: <defaults>
</compile_context>

<pallas_src>
import jax
import jax.numpy as jnp
from jax.experimental import pallas as pl
from jax.experimental.pallas import tpu as pltpu


# ---------------- Pallas kernel ----------------

def _focus_kernel(x_ref, w_ref, o_ref):
    # x_ref: (1, 4C, tile_p)   space-to-depth input, channels in sublanes,
    #                          pixels in lanes (dense)
    # w_ref: (c_out, 4C)       resident fused 1x1-conv weight (BN folded)
    # o_ref: (1, c_out, tile_p)
    acc = jnp.dot(w_ref[...], x_ref[0],
                  preferred_element_type=jnp.float32)        # (c_out, tile_p) f32
    # SiLU(x) = x * sigmoid(x); exp and the approximate reciprocal both run on
    # the EUP slot, keeping the epilogue off the VALU critical path.
    sig = pl.reciprocal(1.0 + jnp.exp(-acc), approx=True)
    o_ref[0] = (acc * sig).astype(o_ref.dtype)


# ---------------- pallas_call wrapper ----------------

def focus_forward(x_nchw, w_mat, *,
                  compute_dtype=jnp.bfloat16,
                  out_dtype=jnp.bfloat16,
                  tile_pixels=None,
                  vmem_budget_bytes=12 * 1024 * 1024):
    """Focus forward (eval mode, BN folded).

    x_nchw: (N, C, H, W); w_mat: (c_out, 4*C) = Conv2d weight[:, :, 0, 0].
    Returns NCHW (N, c_out, H//2, W//2) in `out_dtype` (bf16 by default).
    """
    N, C, H, W = x_nchw.shape
    assert H % 2 == 0 and W % 2 == 0, "Focus needs even spatial dims"
    Ho, Wo = H // 2, W // 2
    P = Ho * Wo
    c_out, c4 = w_mat.shape
    assert c4 == 4 * C

    # Space-to-depth + cast, fused into one XLA transpose (one HBM pass over
    # the *small* input).  Channel order (2p+q)*C + c matches the torch.cat
    # order [ee | eo | oe | oo]; pixel order is row-major (r*Wo + wo).
    xs = (x_nchw.reshape(N, C, Ho, 2, Wo, 2)
                .transpose(0, 3, 5, 1, 2, 4)        # (N, p, q, c, r, wo)
                .reshape(N, c4, P)
                .astype(compute_dtype))
    w = w_mat.astype(compute_dtype)

    in_b = jnp.dtype(compute_dtype).itemsize
    out_b = jnp.dtype(out_dtype).itemsize

    if tile_pixels is None:
        # Per-pixel-column VMEM: double-buffered input + output blocks plus
        # ~2x f32 temporaries for the matmul result / epilogue.
        per_px = 2 * c4 * in_b + 2 * c_out * out_b + 2 * 4 * c_out
        tile_pixels = max(128, vmem_budget_bytes // per_px)
        if N == 1:
            # Keep >= 2 grid steps so the single parallel axis still splits
            # across the two TensorCores on v7x.
            half_p = max(128, ((P + 1) // 2 + 127) // 128 * 128)
            tile_pixels = min(tile_pixels, half_p)
    tile_pixels = int(tile_pixels)
    if tile_pixels >= P:
        tile_pixels = P                                   # full dim: always legal
    else:
        tile_pixels = max(128, (tile_pixels // 128) * 128)  # lane-aligned tiles
    grid_p = pl.cdiv(P, tile_pixels)                      # uneven tail is masked

    out3 = pl.pallas_call(
        _focus_kernel,
        out_shape=jax.ShapeDtypeStruct((N, c_out, P), out_dtype),
        grid_spec=pltpu.PrefetchScalarGridSpec(
            num_scalar_prefetch=0,
            grid=(N, grid_p),
            in_specs=[
                pl.BlockSpec((1, c4, tile_pixels), lambda n, j: (n, 0, j)),
                # weight resident across the whole grid (no per-step re-DMA)
                pl.BlockSpec((c_out, c4), lambda n, j: (0, 0)),
            ],
            out_specs=pl.BlockSpec((1, c_out, tile_pixels), lambda n, j: (n, 0, j)),
        ),
        compiler_params=pltpu.CompilerParams(
            dimension_semantics=("parallel", "parallel"),
            vmem_limit_bytes=32 * 1024 * 1024),
    )(xs, w)

    # Free reshape to NCHW — no output transpose.
    return out3.reshape(N, c_out, Ho, Wo)


# ---------------- parameters (deterministic, synthetic) ----------------

def init_focus_params(key, c_in, c_out):
    c4 = 4 * c_in
    # PyTorch conv weight layout: (c_out, 4*c_in, 1, 1); BN assumed folded.
    w_t = jax.random.normal(key, (c_out, c4, 1, 1), jnp.float32) / jnp.sqrt(float(c4))
    return w_t[:, :, 0, 0]                                 # (c_out, 4C)


# ---------------- pure-JAX reference for validation ----------------

def focus_reference(x_nchw, w_mat):
    ee = x_nchw[:, :, 0::2, 0::2]
    eo = x_nchw[:, :, 0::2, 1::2]
    oe = x_nchw[:, :, 1::2, 0::2]
    oo = x_nchw[:, :, 1::2, 1::2]
    xs = jnp.concatenate([ee, eo, oe, oo], axis=1)         # (N, 4C, Ho, Wo)
    y = jnp.einsum('nchw,dc->ndhw', xs, w_mat)             # 1x1 conv, bias-free
    return y * jax.nn.sigmoid(y)                           # SiLU


if __name__ == "__main__":
    key = jax.random.PRNGKey(0)
    kx, kw = jax.random.split(key)

    N, C, H, W = 2, 4, 16, 16
    c_out = 32
    x = jax.random.normal(kx, (N, C, H, W), jnp.float32)
    w = init_focus_params(kw, C, c_out)

    ref = focus_reference(x, w)

    # f32 path: tight check of the kernel math / layout plumbing (tolerance
    # covers only the approximate EUP reciprocal in the SiLU epilogue).
    out_f32 = jax.block_until_ready(jax.jit(
        lambda a, b: focus_forward(a, b, compute_dtype=jnp.float32,
                                   out_dtype=jnp.float32))(x, w))
    assert out_f32.shape == (N, c_out, H // 2, W // 2)
    assert out_f32.dtype == jnp.float32
    if not jnp.allclose(out_f32, ref, rtol=5e-3, atol=5e-3):
        raise AssertionError("Pallas Focus (f32) does not match reference")

    # Default path: bf16 compute + bf16 output (per perf feedback); f32 MXU acc.
    out_bf16 = jax.block_until_ready(jax.jit(focus_forward)(x, w))
    assert out_bf16.shape == (N, c_out, H // 2, W // 2)
    assert out_bf16.dtype == jnp.bfloat16
    if not jnp.allclose(out_bf16.astype(jnp.float32), ref, rtol=3e-2, atol=3e-2):
        raise AssertionError("Pallas Focus (bf16) does not match reference")

    print("KERNEL_OK")
</pallas_src>

<mosaic_0001>
module attributes {stable_mosaic.version = 11 : i64} {
  func.func @_focus_kernel(%arg0: i32, %arg1: i32, %arg2: memref<1x16x64xf32, #tpu.memory_space<vmem>>, %arg3: memref<32x16xf32, #tpu.memory_space<vmem>>, %arg4: memref<1x32x64xf32, #tpu.memory_space<vmem>>) attributes {dimension_semantics = [#tpu.dimension_semantics<parallel>, #tpu.dimension_semantics<parallel>], iteration_bounds = array<i64: 2, 1>, scalar_prefetch = 0 : i64, scratch_operands = 0 : i64, tpu.core_type = #tpu.core_type<tc>, window_params = [{transform_indices = @transform_0, window_bounds = array<i64: 1, 16, 64>}, {pipeline_mode = #tpu.pipeline_mode<synchronous>, transform_indices = @transform_1, window_bounds = array<i64: 32, 16>}, {transform_indices = @transform_2, window_bounds = array<i64: 1, 32, 64>}]} {
    %c0 = arith.constant 0 : index
    %c0_0 = arith.constant 0 : index
    %0 = vector.load %arg3[%c0, %c0_0] : memref<32x16xf32, #tpu.memory_space<vmem>>, vector<32x16xf32>
    %c0_1 = arith.constant 0 : index
    %c0_2 = arith.constant 0 : index
    %c0_3 = arith.constant 0 : index
    %1 = vector.load %arg2[%c0_1, %c0_2, %c0_3] : memref<1x16x64xf32, #tpu.memory_space<vmem>>, vector<1x16x64xf32>
    %2 = vector.shape_cast %1 : vector<1x16x64xf32> to vector<16x64xf32>
    %cst = arith.constant dense<0.000000e+00> : vector<32x64xf32>
    %3 = tpu.matmul %0, %2, %cst {dimension_numbers = #tpu.dot_dimension_numbers<[1], [0], [0], [1], [0, 0, 1, 1], [], []>} : vector<32x16xf32>, vector<16x64xf32>, vector<32x64xf32> -> vector<32x64xf32>
    %cst_4 = arith.constant 0.000000e+00 : f32
    %4 = vector.broadcast %cst_4 : f32 to vector<32x64xf32>
    %5 = arith.subf %4, %3 : vector<32x64xf32>
    %6 = math.exp %5 : vector<32x64xf32>
    %cst_5 = arith.constant 1.000000e+00 : f32
    %7 = vector.broadcast %cst_5 : f32 to vector<32x64xf32>
    %8 = arith.addf %7, %6 : vector<32x64xf32>
    %9 = tpu.reciprocal %8 {approx = true} : vector<32x64xf32> -> vector<32x64xf32>
    %10 = arith.mulf %3, %9 : vector<32x64xf32>
    %c0_6 = arith.constant 0 : index
    %c0_7 = arith.constant 0 : index
    %c0_8 = arith.constant 0 : index
    %11 = vector.load %arg4[%c0_6, %c0_7, %c0_8] : memref<1x32x64xf32, #tpu.memory_space<vmem>>, vector<1x32x64xf32>
    %12 = vector.shape_cast %11 : vector<1x32x64xf32> to vector<32x64xf32>
    %13 = vector.shape_cast %10 : vector<32x64xf32> to vector<1x32x64xf32>
    tpu.vector_store %arg4[%c0_6, %c0_7, %c0_8], %13 {strides = array<i32>} : memref<1x32x64xf32, #tpu.memory_space<vmem>>, vector<1x32x64xf32>,
    return
  }
  func.func @transform_0(%arg0: i32, %arg1: i32) -> (i32, i32, i32) {
    %c0_i32 = arith.constant 0 : i32
    %c0_i32_0 = arith.constant 0 : i32
    return %arg0, %c0_i32, %arg1 : i32, i32, i32
  }
  func.func @transform_1(%arg0: i32, %arg1: i32) -> (i32, i32) {
    %c0_i32 = arith.constant 0 : i32
    %c0_i32_0 = arith.constant 0 : i32
    %c0_i32_1 = arith.constant 0 : i32
    return %c0_i32, %c0_i32_0 : i32, i32
  }
  func.func @transform_2(%arg0: i32, %arg1: i32) -> (i32, i32, i32) {
    %c0_i32 = arith.constant 0 : i32
    %c0_i32_0 = arith.constant 0 : i32
    return %arg0, %c0_i32, %arg1 : i32, i32, i32
  }
}

</mosaic_0001>

<bundles_post_ra>
// kernel: _lambda_.1
= control target key start
LH: loop header
LB: loop body
LE: loop exit
PB: predicated region body
PF: predicated region fallthrough
CT: control target
= control target key end

     0   :  { %s507_s9 = smov 0   ;;  %s509_s10 = smov 0   ;;  %s560_s0 = inlined_call_operand.vmem [shape: f32[2,16,64], index: 0, kind: input, shape index: {}]   ;;  %s561_s1 = inlined_call_operand.vmem [shape: f32[32,16], index: 1, kind: input, shape index: {}]   ;;  %s562_s2 = inlined_call_operand.vmem [shape: f32[2,32,64], index: 2, kind: output, shape index: {}]  }
   0x1   :  { %s511_s11 = smov 0  }
   0x2 LB: > { %s24_s12 = sadd.s32 1, %s486_s10  ;;  %p395_p0 = scmp.ge.s32.totalorder %s490_s11, 1  ;;  %s490_s11 = sphi %s511_s11, %s12_s11   ;;  %s486_s10 = sphi %s509_s10, %s564_s10   ;;  %s482_s9 = sphi %s507_s9, %s563_s9  }
   0x3   : > { %p26_p1 = scmp.ge.s32.totalorder %s24_s12, 2  ;;  %p131_p2 = scmp.lt.s32.totalorder %s490_s11, 3 }
   0x5   : > { %s566_s12 = smov (%p26_p1, %s24_s12), 0  ;;  %p132_p3 = pnand %p395_p0, %p131_p2 }
   0x6   : > { %p159_p4 = scmp.lt.s32.totalorder (!%p132_p3), %s482_s9, 1 }
   0x7   : > { %135 = sbr.rel (%p132_p3) target bundleno = 253 (0xfd), region = 28 }
   0xc   : > { %v175_v0 = vld [vmem:[%s561_s1] sm:$0xff]  ;;  %vm181_vm0 = vcmask 130048   ;;  %v177_v1 = vld [vmem:[%s561_s1 + $0x10] sm:$0xff]  ;;  %s568_s9 = smov (!%p159_p4, %s482_s9), 1  ;;  %v176_v4 = vld [vmem:[%s561_s1 + $0x8] sm:$0xff]  ;;  %vm303_vm1 = vcmask 523264  }
   0xd   : > { %418 = vmatprep.mubr.msk.f32.mxu0 %vm181_vm0, %v175_v0  ;;  %421 = vmatprep.mubr.msk.f32.mxu1 %vm181_vm0, %v177_v1  ;;  %s406_s17 = sshll.u32 %s568_s9, 4  ;;  %v178_v5 = vld [vmem:[%s561_s1 + $0x18] sm:$0xff]  ;;  %s407_s25 = sshll.u32 %s568_s9, 5 }
   0xe   : > { %s166_s20 = scalar_lea.vmem %s560_s0, %s406_s17  ;;  %s174_s28 = scalar_lea.vmem %s562_s2, %s407_s25 }
   0xf   : > { %v180_v2 = vld [vmem:[%s166_s20 + $0x8] sm:$0xff]  ;;  %v179_v3 = vld [vmem:[%s166_s20] sm:$0xff] }
  0x10   : > { %414 = vmatprep.subr.mxu0 %v180_v2  ;;  %424 = vmatprep.subr.mxu1 %v180_v2 }
  0x11   : > { %415 = vmatpush3.msra.mxu0 %v180_v2  ;;  %426 = vmatpush3.msra.mxu1 %v180_v2 }
  0x12   : > { %416 = vmatprep.subr.mxu0 %v179_v3  ;;  %425 = vmatprep.subr.mxu1 %v179_v3 }
  0x13   : > { %417 = vmatpush3.msra.mxu0 %v179_v3  ;;  %427 = vmatpush3.msra.mxu1 %v179_v3 }
  0x14   : > { %419 = vmatmul.mubr.msk.f32.vlgmr.msra.gmra.mxu0 %vm181_vm0, %v176_v4  ;;  %422 = vmatmul.mubr.msk.f32.vlgmr.msra.gmra.mxu1 %vm181_vm0, %v178_v5 }
  0xd4   : > { %v420_v6 = vpop.f32.mrf.mxu0  ;;  %v423_v7 = vpop.f32.mrf.mxu1 }
  0xd5   : > { %v280_v8 = vsub.f32 0.0, %v420_v6  ;;  %v282_v9 = vsub.f32 0.0, %v423_v7 }
  0xd6   : > { %v260_v10 = vpop.f32.mrf.mxu0  ;;  %v270_v11 = vpop.f32.mrf.mxu1 }
  0xd7   : > { %v285_v12 = vmul.f32 1.442695, %v280_v8  ;;  %v289_v13 = vmul.f32 1.442695, %v282_v9  ;;  %v279_v14 = vsub.f32 0.0, %v260_v10  ;;  %v281_v15 = vsub.f32 0.0, %v270_v11 }
  0xd9   : > { %452 = vpow2.f32 %v285_v12  ;;  %v283_v16 = vmul.f32 1.442695, %v279_v14  ;;  %v287_v17 = vmul.f32 1.442695, %v281_v15 }
  0xda   : > { %454 = vpow2.f32 %v289_v13 }
  0xdb   : > { %456 = vpow2.f32 %v283_v16 }
  0xdc   : > { %458 = vpow2.f32 %v287_v17 }
  0xe6   : > { %v453_v18 = vpop.eup %452 }
  0xe7   : > { %v455_v19 = vpop.eup %454  ;;  %v292_v20 = vadd.f32 1.0, %v453_v18 }
  0xe8   : > { %v457_v21 = vpop.eup %456  ;;  %v294_v22 = vadd.f32 1.0, %v455_v19 }
  0xe9   : > { %v459_v23 = vpop.eup %458  ;;  %460 = vrcp.f32 %v292_v20  ;;  %v291_v24 = vadd.f32 1.0, %v457_v21 }
  0xea   : > { %462 = vrcp.f32 %v294_v22  ;;  %v293_v25 = vadd.f32 1.0, %v459_v23 }
  0xeb   : > { %464 = vrcp.f32 %v291_v24 }
  0xec   : > { %466 = vrcp.f32 %v293_v25 }
  0xf6   : > { %v461_v26 = vpop.eup %460 }
  0xf7   : > { %v463_v27 = vpop.eup %462  ;;  %v300_v28 = vmul.f32 %v461_v26, %v420_v6 }
  0xf8   : > { %v465_v29 = vpop.eup %464  ;;  %v302_v30 = vmul.f32 %v463_v27, %v423_v7 }
  0xf9   : > { %v467_v31 = vpop.eup %466  ;;  %305 = vst.msk [vmem:[%s174_s28 + $0x8] sm:$0xff] %vm303_vm1, %v300_v28  ;;  %v299_v32 = vmul.f32 %v465_v29, %v260_v10 }
  0xfa   : > { %307 = vst.msk [vmem:[%s174_s28 + $0x18] sm:$0xff] %vm303_vm1, %v302_v30  ;;  %v301_v33 = vmul.f32 %v467_v31, %v270_v11 }
  0xfb   : > { %304 = vst.msk [vmem:[%s174_s28] sm:$0xff] %vm303_vm1, %v299_v32 }
  0xfc   : > { %306 = vst.msk [vmem:[%s174_s28 + $0x10] sm:$0xff] %vm303_vm1, %v301_v33 }
  0xfd PF: > { %s12_s11 = sadd.s32 1, %s490_s11   ;;  %s563_s9 = smov %s486_s10 }
  0xfe   : > { %p9_p5 = scmp.ge.s32.totalorder %s12_s11, 4   ;;  %s564_s10 = smov %s566_s12 }
 0x100   :  { %11 = sbr.rel (!%p9_p5) target bundleno = 2 (0x2), region = 58 }

</bundles_post_ra>
